<compile_context>
chip_gen: v6e
topology: v6e:2x2x1
jax: 0.10.0
libtpu: 0.0.40
codegen_flags: <defaults>
</compile_context>

<pallas_src>
import jax
import jax.numpy as jnp
from jax import lax
from jax.experimental import pallas as pl
from jax.experimental.pallas import tpu as pltpu


_LN_EPS = 1e-5
_GELU_C = 0.7978845608028654  # sqrt(2/pi)


def _sigmoid(x):
    return 1.0 / (1.0 + jnp.exp(-x))


def _gelu_tanh(x):
    # TODO(synk): PyTorch F.gelu defaults to the exact erf form; the tanh
    # approximation (max abs deviation ~1e-3) is used to stay on EUP-native ops.
    return 0.5 * x * (1.0 + jnp.tanh(_GELU_C * (x + 0.044715 * x * x * x)))


def _round_up(a, b):
    return (a + b - 1) // b * b


def _pick_row_tile(nt):
    """Row tile for stage 1: largest multiple-of-8 divisor of nt (<=512)."""
    if nt <= 512:
        return nt, nt                      # single block; full-dim is allowed
    for cand in range(512, 127, -8):
        if nt % cand == 0:
            return cand, nt
    return 256, _round_up(nt, 256)         # rare fallback: pad rows


# ----------------------------------------------------------------------------
# Stage 1: LayerNorm + GELU + fused input projection (both directions, bf16)
# ----------------------------------------------------------------------------
def _ln_gelu_proj_kernel(x_ref, g_ref, b_ref, w_ref, bi_ref, o_ref):
    x = x_ref[...]                                        # (tm, D) f32
    mu = jnp.mean(x, axis=-1, keepdims=True)
    xc = x - mu
    var = jnp.mean(xc * xc, axis=-1, keepdims=True)
    xn = xc * lax.rsqrt(var + _LN_EPS) * g_ref[...] + b_ref[...]
    act = _gelu_tanh(xn).astype(jnp.bfloat16)             # bf16 MXU operand
    res = jnp.dot(act, w_ref[...], preferred_element_type=jnp.float32)
    res = res + bi_ref[...]                               # (tm, 6Hp) f32
    g3p = o_ref.shape[-1]
    o_ref[0] = res[:, :g3p].astype(o_ref.dtype)           # forward gates (bf16)
    o_ref[1] = res[:, g3p:].astype(o_ref.dtype)           # backward gates


# ----------------------------------------------------------------------------
# Stage 2: time-blocked bidirectional GRU recurrence
#   grid = (2 directions, nb time blocks); one direction per grid step.
# ----------------------------------------------------------------------------
def _make_gru_block_kernel(tb, nb, t_real, t_padded):
    mask_time = (t_padded != t_real)

    def kernel(gi_ref, whh_ref, bhn_ref, out_ref, h_scr):
        d = pl.program_id(0)              # 0 = forward, 1 = backward
        i = pl.program_id(1)              # per-direction time-block counter

        @pl.when(i == 0)
        def _():
            h_scr[...] = jnp.zeros_like(h_scr)

        hp = h_scr.shape[-1]
        whh = whh_ref[...]                # (Hp, 3Hp) f32
        bhn = bhn_ref[...]                # (1, Hp)   f32  (candidate-gate bias)
        blk = i + d * (nb - 1 - 2 * i)    # actual time-block index of this step

        def body(j, h):
            local = j + d * (tb - 1 - 2 * j)           # fwd: j ; bwd: tb-1-j
            gi = gi_ref[local].astype(jnp.float32)     # (N, 3Hp)
            gh = jnp.dot(h, whh, preferred_element_type=jnp.float32)
            r = _sigmoid(gi[:, :hp] + gh[:, :hp])
            z = _sigmoid(gi[:, hp:2 * hp] + gh[:, hp:2 * hp])
            c = jnp.tanh(gi[:, 2 * hp:] + r * (gh[:, 2 * hp:] + bhn))
            h_new = (1.0 - z) * c + z * h
            if mask_time:
                t = blk * tb + local
                h_new = jnp.where(t < t_real, h_new, h)  # padded steps: hold h
            out_ref[local] = h_new
            return h_new

        h_last = lax.fori_loop(0, tb, body, h_scr[...], unroll=True)
        h_scr[...] = h_last

    return kernel


def _pad_gate_axis(w, h, hp, axis):
    """Split the 3H gate axis into r/z/n chunks, zero-pad each to hp, concat."""
    chunks = jnp.split(w, 3, axis=axis)
    pad = [(0, 0)] * w.ndim
    pad[axis] = (0, hp - h)
    return jnp.concatenate([jnp.pad(c, pad) for c in chunks], axis=axis)


def bigru_forward(x, params, *, batch_first=True):
    """Pallas equivalent of BiGRU.forward(x).  Dropout = identity (eval)."""
    if batch_first:
        x = jnp.swapaxes(x, 0, 1)                        # -> (T, N, D) time-major
    t_real, n, d = x.shape
    h = params["w_hh_f"].shape[1]
    hp = _round_up(h, 128)                               # lane-dense gate blocks
    g3p, g6p = 3 * hp, 6 * hp

    tb = min(16, t_real)                                 # timesteps per grid step
    t_pad = _round_up(t_real, tb)
    nb = t_pad // tb

    x = x.astype(jnp.float32)
    if t_pad != t_real:
        x = jnp.pad(x, ((0, t_pad - t_real), (0, 0), (0, 0)))

    # ------------- weights / biases: lane-padded, biases folded --------------
    def prep_dir(sfx):
        w_ih = params[f"w_ih_{sfx}"].astype(jnp.float32)   # (3H, D)
        w_hh = params[f"w_hh_{sfx}"].astype(jnp.float32)   # (3H, H)
        b_ih = params[f"b_ih_{sfx}"].astype(jnp.float32)   # (3H,)
        b_hh = params[f"b_hh_{sfx}"].astype(jnp.float32)   # (3H,)
        w_i = _pad_gate_axis(w_ih.T, h, hp, axis=1)        # (D, 3Hp)
        w_h = _pad_gate_axis(w_hh.T, h, hp, axis=1)        # (H, 3Hp)
        w_h = jnp.pad(w_h, ((0, hp - h), (0, 0)))          # (Hp, 3Hp)
        # Fold b_hh's r/z parts into the input-side bias; PyTorch GRU only
        # needs the candidate-gate hidden bias inside r * (...).
        b_fold = b_ih + jnp.concatenate(
            [b_hh[:2 * h], jnp.zeros((h,), jnp.float32)])
        b_i = _pad_gate_axis(b_fold, h, hp, axis=0)        # (3Hp,)
        b_hn = jnp.pad(b_hh[2 * h:], (0, hp - h)).reshape(1, hp)
        return w_i, w_h, b_i, b_hn

    wif, whf, bif, bhnf = prep_dir("f")
    wib, whb, bib, bhnb = prep_dir("b")

    w_i = jnp.concatenate([wif, wib], axis=1).astype(jnp.bfloat16)   # (D, 6Hp)
    b_i = jnp.concatenate([bif, bib]).reshape(1, g6p)                # (1, 6Hp)
    w_hh = jnp.stack([whf, whb])                                     # (2, Hp, 3Hp)
    b_hn = jnp.stack([bhnf, bhnb])                                   # (2, 1, Hp)
    gamma = params["ln_w"].reshape(1, d).astype(jnp.float32)
    beta = params["ln_b"].reshape(1, d).astype(jnp.float32)

    # --------------- stage 1: LN + GELU + input projection -------------------
    nt = t_pad * n
    x2d = x.reshape(nt, d)
    tm, nt_p = _pick_row_tile(nt)
    if nt_p != nt:
        x2d = jnp.pad(x2d, ((0, nt_p - nt), (0, 0)))

    gates = pl.pallas_call(
        _ln_gelu_proj_kernel,
        out_shape=jax.ShapeDtypeStruct((2, nt_p, g3p), jnp.bfloat16),
        grid_spec=pltpu.PrefetchScalarGridSpec(
            num_scalar_prefetch=0,
            grid=(nt_p // tm,),
            in_specs=[
                pl.BlockSpec((tm, d), lambda i: (i, 0)),    # x rows (time-major)
                pl.BlockSpec((1, d), lambda i: (0, 0)),     # ln gamma
                pl.BlockSpec((1, d), lambda i: (0, 0)),     # ln beta
                pl.BlockSpec((d, g6p), lambda i: (0, 0)),   # W_ih (both dirs, bf16)
                pl.BlockSpec((1, g6p), lambda i: (0, 0)),   # folded input bias
            ],
            out_specs=pl.BlockSpec((2, tm, g3p), lambda i: (0, i, 0)),
        ),
        compiler_params=pltpu.CompilerParams(
            dimension_semantics=("parallel",)),
    )(x2d, gamma, beta, w_i, b_i)

    if nt_p != nt:
        gates = gates[:, :nt]
    gates = gates.reshape(2, t_pad, n, g3p)               # free: leading-dim split

    # --------------- stage 2: blocked bidirectional recurrence ---------------
    def fb_block(di, ti):                                  # fwd: ti ; bwd: nb-1-ti
        return ti + di * (nb - 1 - 2 * ti)

    out = pl.pallas_call(
        _make_gru_block_kernel(tb, nb, t_real, t_pad),
        out_shape=jax.ShapeDtypeStruct((2, t_pad, n, hp), jnp.float32),
        grid_spec=pltpu.PrefetchScalarGridSpec(
            num_scalar_prefetch=0,
            grid=(2, nb),
            in_specs=[
                pl.BlockSpec((None, tb, n, g3p),
                             lambda di, ti: (di, fb_block(di, ti), 0, 0)),
                pl.BlockSpec((None, hp, g3p), lambda di, ti: (di, 0, 0)),
                pl.BlockSpec((None, 1, hp), lambda di, ti: (di, 0, 0)),
            ],
            out_specs=pl.BlockSpec((None, tb, n, hp),
                                   lambda di, ti: (di, fb_block(di, ti), 0, 0)),
            scratch_shapes=[pltpu.VMEM((n, hp), jnp.float32)],  # carried hidden
        ),
        compiler_params=pltpu.CompilerParams(
            dimension_semantics=("parallel", "arbitrary")),
    )(gates, w_hh, b_hn)

    out_f = out[0, :t_real, :, :h]
    out_b = out[1, :t_real, :, :h]
    res = jnp.concatenate([out_f, out_b], axis=-1)         # (T, N, 2H)
    if batch_first:
        res = jnp.swapaxes(res, 0, 1)                      # (N, T, 2H)
    # TODO(synk): nn.Dropout is identity here (inference); training-mode dropout
    # would use pltpu.prng_seed + pltpu.prng_random_bits inside the kernel.
    return res


# ----------------------------------------------------------------------------
# Pure-JAX f32 reference matching the PyTorch module semantics (same GELU approx)
# ----------------------------------------------------------------------------
def _reference_bigru(x, params):
    n, t, d = x.shape
    h = params["w_hh_f"].shape[1]
    mu = x.mean(-1, keepdims=True)
    var = ((x - mu) ** 2).mean(-1, keepdims=True)
    xn = (x - mu) / jnp.sqrt(var + _LN_EPS) * params["ln_w"] + params["ln_b"]
    act = _gelu_tanh(xn)

    def run(w_ih, w_hh, b_ih, b_hh, reverse):
        seq = act[:, ::-1, :] if reverse else act
        gi = jnp.einsum("ntd,gd->ntg", seq, w_ih) + b_ih    # (N, T, 3H)

        def step(h_prev, gi_t):
            gh = h_prev @ w_hh.T + b_hh
            r = jax.nn.sigmoid(gi_t[:, :h] + gh[:, :h])
            z = jax.nn.sigmoid(gi_t[:, h:2 * h] + gh[:, h:2 * h])
            cand = jnp.tanh(gi_t[:, 2 * h:] + r * gh[:, 2 * h:])
            h_new = (1.0 - z) * cand + z * h_prev
            return h_new, h_new

        _, hs = jax.lax.scan(step, jnp.zeros((n, h), jnp.float32),
                             jnp.swapaxes(gi, 0, 1))
        hs = jnp.swapaxes(hs, 0, 1)                         # (N, T, H)
        return hs[:, ::-1, :] if reverse else hs

    out_f = run(params["w_ih_f"], params["w_hh_f"],
                params["b_ih_f"], params["b_hh_f"], False)
    out_b = run(params["w_ih_b"], params["w_hh_b"],
                params["b_ih_b"], params["b_hh_b"], True)
    return jnp.concatenate([out_f, out_b], axis=-1)


if __name__ == "__main__":
    N, T, RNN_DIM, HIDDEN = 2, 8, 32, 32
    key = jax.random.PRNGKey(0)
    keys = jax.random.split(key, 11)

    def w(k, shape, scale=0.1):
        return scale * jax.random.normal(k, shape, dtype=jnp.float32)

    params = {
        "ln_w": 1.0 + w(keys[0], (RNN_DIM,)),
        "ln_b": w(keys[1], (RNN_DIM,)),
        "w_ih_f": w(keys[2], (3 * HIDDEN, RNN_DIM)),
        "w_hh_f": w(keys[3], (3 * HIDDEN, HIDDEN)),
        "b_ih_f": w(keys[4], (3 * HIDDEN,)),
        "b_hh_f": w(keys[5], (3 * HIDDEN,)),
        "w_ih_b": w(keys[6], (3 * HIDDEN, RNN_DIM)),
        "w_hh_b": w(keys[7], (3 * HIDDEN, HIDDEN)),
        "b_ih_b": w(keys[8], (3 * HIDDEN,)),
        "b_hh_b": w(keys[9], (3 * HIDDEN,)),
    }
    x = jax.random.normal(keys[10], (N, T, RNN_DIM), dtype=jnp.float32)

    out = bigru_forward(x, params, batch_first=True)
    out = jax.block_until_ready(out)
    ref = _reference_bigru(x, params)

    assert out.shape == (N, T, 2 * HIDDEN), out.shape
    # Tolerance accounts for bf16 MXU operands + bf16 inter-stage gate storage
    # (the recurrence itself, the carried hidden state and all nonlinearities
    # stay in f32).
    err = float(jnp.max(jnp.abs(out - ref)))
    assert jnp.allclose(out, ref, atol=5e-2, rtol=5e-2), err

    print("KERNEL_OK")
</pallas_src>

<mosaic_0001>
module attributes {stable_mosaic.version = 11 : i64} {
  func.func @_ln_gelu_proj_kernel(%arg0: i32, %arg1: memref<16x32xf32, #tpu.memory_space<vmem>>, %arg2: memref<1x32xf32, #tpu.memory_space<vmem>>, %arg3: memref<1x32xf32, #tpu.memory_space<vmem>>, %arg4: memref<32x768xbf16, #tpu.memory_space<vmem>>, %arg5: memref<1x768xf32, #tpu.memory_space<vmem>>, %arg6: memref<2x16x384xbf16, #tpu.memory_space<vmem>>) attributes {dimension_semantics = [#tpu.dimension_semantics<parallel>], iteration_bounds = array<i64: 1>, scalar_prefetch = 0 : i64, scratch_operands = 0 : i64, tpu.core_type = #tpu.core_type<tc>, window_params = [{transform_indices = @transform_0, window_bounds = array<i64: 16, 32>}, {pipeline_mode = #tpu.pipeline_mode<synchronous>, transform_indices = @transform_1, window_bounds = array<i64: 1, 32>}, {pipeline_mode = #tpu.pipeline_mode<synchronous>, transform_indices = @transform_2, window_bounds = array<i64: 1, 32>}, {pipeline_mode = #tpu.pipeline_mode<synchronous>, transform_indices = @transform_3, window_bounds = array<i64: 32, 768>}, {pipeline_mode = #tpu.pipeline_mode<synchronous>, transform_indices = @transform_4, window_bounds = array<i64: 1, 768>}, {transform_indices = @transform_5, window_bounds = array<i64: 2, 16, 384>}]} {
    %c0 = arith.constant 0 : index
    %c0_0 = arith.constant 0 : index
    %0 = vector.load %arg1[%c0, %c0_0] : memref<16x32xf32, #tpu.memory_space<vmem>>, vector<16x32xf32>
    %cst = arith.constant dense<0.000000e+00> : vector<16xf32>
    %1 = vector.multi_reduction <add>, %0, %cst [1] : vector<16x32xf32> to vector<16xf32>
    %2 = vector.shape_cast %1 : vector<16xf32> to vector<16x1xf32>
    %cst_1 = arith.constant 3.200000e+01 : f32
    %3 = vector.broadcast %cst_1 : f32 to vector<16x1xf32>
    %4 = arith.divf %2, %3 : vector<16x1xf32>
    %5 = vector.broadcast %4 : vector<16x1xf32> to vector<16x32xf32>
    %6 = arith.subf %0, %5 : vector<16x32xf32>
    %7 = arith.mulf %6, %6 : vector<16x32xf32>
    %cst_2 = arith.constant dense<0.000000e+00> : vector<16xf32>
    %8 = vector.multi_reduction <add>, %7, %cst_2 [1] : vector<16x32xf32> to vector<16xf32>
    %9 = vector.shape_cast %8 : vector<16xf32> to vector<16x1xf32>
    %cst_3 = arith.constant 3.200000e+01 : f32
    %10 = vector.broadcast %cst_3 : f32 to vector<16x1xf32>
    %11 = arith.divf %9, %10 : vector<16x1xf32>
    %cst_4 = arith.constant 9.99999974E-6 : f32
    %12 = vector.broadcast %cst_4 : f32 to vector<16x1xf32>
    %13 = arith.addf %11, %12 : vector<16x1xf32>
    %14 = math.rsqrt %13 : vector<16x1xf32>
    %15 = vector.broadcast %14 : vector<16x1xf32> to vector<16x32xf32>
    %16 = arith.mulf %6, %15 : vector<16x32xf32>
    %c0_5 = arith.constant 0 : index
    %c0_6 = arith.constant 0 : index
    %17 = vector.load %arg2[%c0_5, %c0_6] : memref<1x32xf32, #tpu.memory_space<vmem>>, vector<1x32xf32>
    %18 = vector.broadcast %17 : vector<1x32xf32> to vector<16x32xf32>
    %19 = arith.mulf %16, %18 : vector<16x32xf32>
    %c0_7 = arith.constant 0 : index
    %c0_8 = arith.constant 0 : index
    %20 = vector.load %arg3[%c0_7, %c0_8] : memref<1x32xf32, #tpu.memory_space<vmem>>, vector<1x32xf32>
    %21 = vector.broadcast %20 : vector<1x32xf32> to vector<16x32xf32>
    %22 = arith.addf %19, %21 : vector<16x32xf32>
    %cst_9 = arith.constant 5.000000e-01 : f32
    %23 = vector.broadcast %cst_9 : f32 to vector<16x32xf32>
    %24 = arith.mulf %23, %22 : vector<16x32xf32>
    %cst_10 = arith.constant 4.471500e-02 : f32
    %25 = vector.broadcast %cst_10 : f32 to vector<16x32xf32>
    %26 = arith.mulf %25, %22 : vector<16x32xf32>
    %27 = arith.mulf %26, %22 : vector<16x32xf32>
    %28 = arith.mulf %27, %22 : vector<16x32xf32>
    %29 = arith.addf %22, %28 : vector<16x32xf32>
    %cst_11 = arith.constant 0.797884583 : f32
    %30 = vector.broadcast %cst_11 : f32 to vector<16x32xf32>
    %31 = arith.mulf %30, %29 : vector<16x32xf32>
    %32 = math.tanh %31 : vector<16x32xf32>
    %cst_12 = arith.constant 1.000000e+00 : f32
    %33 = vector.broadcast %cst_12 : f32 to vector<16x32xf32>
    %34 = arith.addf %33, %32 : vector<16x32xf32>
    %35 = arith.mulf %24, %34 : vector<16x32xf32>
    %36 = arith.truncf %35 : vector<16x32xf32> to vector<16x32xbf16>
    %c0_13 = arith.constant 0 : index
    %c0_14 = arith.constant 0 : index
    %37 = vector.load %arg4[%c0_13, %c0_14] : memref<32x768xbf16, #tpu.memory_space<vmem>>, vector<32x768xbf16>
    %cst_15 = arith.constant dense<0.000000e+00> : vector<16x768xf32>
    %38 = tpu.matmul %36, %37, %cst_15 {dimension_numbers = #tpu.dot_dimension_numbers<[1], [0], [0], [1], [0, 0, 1, 1], [], []>} : vector<16x32xbf16>, vector<32x768xbf16>, vector<16x768xf32> -> vector<16x768xf32>
    %c0_16 = arith.constant 0 : index
    %c0_17 = arith.constant 0 : index
    %39 = vector.load %arg5[%c0_16, %c0_17] : memref<1x768xf32, #tpu.memory_space<vmem>>, vector<1x768xf32>
    %40 = vector.broadcast %39 : vector<1x768xf32> to vector<16x768xf32>
    %41 = arith.addf %38, %40 : vector<16x768xf32>
    %42 = vector.extract_strided_slice %41 {offsets = [0, 0], sizes = [16, 384], strides = [1, 1]} : vector<16x768xf32> to vector<16x384xf32>
    %43 = arith.truncf %42 : vector<16x384xf32> to vector<16x384xbf16>
    %c0_18 = arith.constant 0 : index
    %c0_19 = arith.constant 0 : index
    %c0_20 = arith.constant 0 : index
    %44 = vector.load %arg6[%c0_18, %c0_19, %c0_20] : memref<2x16x384xbf16, #tpu.memory_space<vmem>>, vector<1x16x384xbf16>
    %45 = vector.shape_cast %44 : vector<1x16x384xbf16> to vector<16x384xbf16>
    %46 = vector.shape_cast %43 : vector<16x384xbf16> to vector<1x16x384xbf16>
    tpu.vector_store %arg6[%c0_18, %c0_19, %c0_20], %46 {strides = array<i32>} : memref<2x16x384xbf16, #tpu.memory_space<vmem>>, vector<1x16x384xbf16>,
    %47 = vector.extract_strided_slice %41 {offsets = [0, 384], sizes = [16, 384], strides = [1, 1]} : vector<16x768xf32> to vector<16x384xf32>
    %48 = arith.truncf %47 : vector<16x384xf32> to vector<16x384xbf16>
    %c1 = arith.constant 1 : index
    %c0_21 = arith.constant 0 : index
    %c0_22 = arith.constant 0 : index
    %49 = vector.load %arg6[%c1, %c0_21, %c0_22] : memref<2x16x384xbf16, #tpu.memory_space<vmem>>, vector<1x16x384xbf16>
    %50 = vector.shape_cast %49 : vector<1x16x384xbf16> to vector<16x384xbf16>
    %51 = vector.shape_cast %48 : vector<16x384xbf16> to vector<1x16x384xbf16>
    tpu.vector_store %arg6[%c1, %c0_21, %c0_22], %51 {strides = array<i32>} : memref<2x16x384xbf16, #tpu.memory_space<vmem>>, vector<1x16x384xbf16>,
    return
  }
  func.func @transform_0(%arg0: i32) -> (i32, i32) {
    %c0_i32 = arith.constant 0 : i32
    %c0_i32_0 = arith.constant 0 : i32
    return %arg0, %c0_i32 : i32, i32
  }
  func.func @transform_1(%arg0: i32) -> (i32, i32) {
    %c0_i32 = arith.constant 0 : i32
    %c0_i32_0 = arith.constant 0 : i32
    %c0_i32_1 = arith.constant 0 : i32
    return %c0_i32, %c0_i32_0 : i32, i32
  }
  func.func @transform_2(%arg0: i32) -> (i32, i32) {
    %c0_i32 = arith.constant 0 : i32
    %c0_i32_0 = arith.constant 0 : i32
    %c0_i32_1 = arith.constant 0 : i32
    return %c0_i32, %c0_i32_0 : i32, i32
  }
  func.func @transform_3(%arg0: i32) -> (i32, i32) {
    %c0_i32 = arith.constant 0 : i32
    %c0_i32_0 = arith.constant 0 : i32
    %c0_i32_1 = arith.constant 0 : i32
    return %c0_i32, %c0_i32_0 : i32, i32
  }
  func.func @transform_4(%arg0: i32) -> (i32, i32) {
    %c0_i32 = arith.constant 0 : i32
    %c0_i32_0 = arith.constant 0 : i32
    %c0_i32_1 = arith.constant 0 : i32
    return %c0_i32, %c0_i32_0 : i32, i32
  }
  func.func @transform_5(%arg0: i32) -> (i32, i32, i32) {
    %c0_i32 = arith.constant 0 : i32
    %c0_i32_0 = arith.constant 0 : i32
    %c0_i32_1 = arith.constant 0 : i32
    return %c0_i32, %arg0, %c0_i32_0 : i32, i32, i32
  }
}

</mosaic_0001>

<bundles_post_ra>
// kernel: tpu_custom_call.1
= control target key start
LH: loop header
LB: loop body
LE: loop exit
PB: predicated region body
PF: predicated region fallthrough
CT: control target
= control target key end

     0   :  { %10 = vsyncpa [#allocation3], 0  ;;  %s653_s0 = inlined_call_operand.hbm [shape: f32[16,32], index: 0, kind: input, shape index: {}]   ;;  %s654_s1 = inlined_call_operand.vmem [shape: f32[1,32], index: 1, kind: input, shape index: {}]   ;;  %s655_s2 = inlined_call_operand.hbm [shape: f32[1,32], index: 2, kind: input, shape index: {}]   ;;  %s656_s3 = inlined_call_operand.hbm [shape: bf16[32,768], index: 3, kind: input, shape index: {}]   ;;  %s657_s4 = inlined_call_operand.vmem [shape: f32[1,768], index: 4, kind: input, shape index: {}]   ;;  %s658_s5 = inlined_call_operand.hbm [shape: bf16[2,16,384], index: 5, kind: output, shape index: {}]  }
   0x1   :  { %11 = vsyncpa [#allocation6], 0 }
   0x2   :  { %12 = vsyncpa [#allocation4], 0  ;;  %s587_s18 = smov [#allocation5]   ;;  %s588_s20 = smov [#allocation2]  }
   0x3   :  { %s33_s19 = sshll.u32 %s587_s18, 4  ;;  %s18_s21 = sshll.u32 %s588_s20, 4  ;;  %s34_s19 = int_to_ptr.vmem [resolvable:$true] %s33_s19  ;;  %s19_s21 = int_to_ptr.vmem [resolvable:$true] %s18_s21 }
   0x4   :  { %s509_s22 = scalar_lea.vmem %s34_s19, 16  ;;  %s513_s23 = scalar_lea.vmem %s34_s19, 32 }
   0x5   :  { %p510_p0 = scmp.ne.s32.totalorder %s34_s19, %s509_s22  ;;  %p514_p1 = scmp.lt.s32.totalorder %s34_s19, %s34_s19 }
   0x6   :  { %p515_p2 = scmp.lt.s32.totalorder %s513_s23, %s509_s22 }
   0x8   :  { %p516_p3 = por %p515_p2, %p514_p1 }
   0xa   :  { %p517_p4 = pnand %p516_p3, %p510_p0 }
   0xc   :  { %520 = shalt.err (!%p517_p4)
}
   0xd   :  { %36 = dma.hbm_to_vmem [thread:$0]  %s655_s2, 16, %s34_s19, [#allocation6]  }
   0xe   :  { %s529_s26 = scalar_lea.vmem %s19_s21, 256  ;;  %p534_p6 = scmp.lt.s32.totalorder %s19_s21, %s19_s21 }
   0xf   :  { %p530_p5 = scmp.ne.s32.totalorder %s19_s21, %s529_s26  ;;  %p535_p7 = scmp.lt.s32.totalorder %s529_s26, %s529_s26 }
  0x11   :  { %p536_p8 = por %p535_p7, %p534_p6 }
  0x13   :  { %p537_p9 = pnand %p536_p8, %p530_p5 }
  0x15   :  { %540 = shalt.err (!%p537_p9)
}
  0x16   :  { %s589_s27 = smov 128   ;;  %s590_s28 = smov 8  }
  0x17   :  { %24 = dma.hbm_to_vmem [thread:$0]  %s653_s0, 256, %s19_s21, [#allocation3], %s589_s27, %s589_s27, %s590_s28  }
  0x18   :  { %s591_s6 = smov [#allocation7]  }
  0x19   :  { %s42_s7 = sshll.u32 %s591_s6, 4  ;;  %s43_s7 = int_to_ptr.vmem [resolvable:$true] %s42_s7 }
  0x1a   :  { %s549_s8 = scalar_lea.vmem %s43_s7, 1536  ;;  %p554_p11 = scmp.lt.s32.totalorder %s43_s7, %s43_s7 }
  0x1b   :  { %p550_p10 = scmp.ne.s32.totalorder %s43_s7, %s549_s8  ;;  %p555_p12 = scmp.lt.s32.totalorder %s549_s8, %s549_s8 }
  0x1d   :  { %p556_p13 = por %p555_p12, %p554_p11 }
  0x1f   :  { %p557_p0 = pnand %p556_p13, %p550_p10 }
  0x21   :  { %560 = shalt.err (!%p557_p0)
}
  0x22   :  { %s592_s2 = smov 384   ;;  %s593_s9 = smov 24  }
  0x23   :  { %48 = dma.hbm_to_vmem [thread:$0]  %s656_s3, 1536, %s43_s7, [#allocation6], %s592_s2, %s592_s2, %s593_s9  }
  0x24   :  { %581 = dma.done.wait [#allocation3], 256  }
  0x25   :  { %582 = vsyncadd [#allocation3], 4294967040 }
  0x26   :  { %583 = dma.done.wait [#allocation6], 1552  }
  0x27   :  { %584 = vsyncadd [#allocation6], 4294965744  ;;  %vm63_vm0 = vcmask 261120   ;;  %v61_v0 = vld [vmem:[#allocation2] sm:$0xff]  ;;  %v62_v1 = vld [vmem:[#allocation2 + $0x8] sm:$0xff]  ;;  %v594_v23 = vmov 0   ;;  %v142_v62 = vlaneseq }
  0x28   :  { %v64_v2 = vsel %vm63_vm0, %v61_v0, 0.0  ;;  %v67_v3 = vsel %vm63_vm0, %v62_v1, 0.0  ;;  %v475_v14 = vld [vmem:[#allocation7 + $0x34] ss:$24 sps:$4 sm:$0xff]   ;;  %v477_v15 = vld [vmem:[#allocation7 + $0x30] ss:$24 sps:$4 sm:$0xff]   ;;  %267 = vmatprep.mubr.bf16.mxu0 %v594_v23  ;;  %310 = vmatprep.mubr.bf16.mxu1 %v594_v23 }
  0x29   :  { %65 = vadd.xlane.f32.xlu0 %v64_v2  ;;  %v478_v16 = vld [vmem:[#allocation7 + $0x3c] ss:$24 sps:$4 sm:$0xff]   ;;  %v480_v17 = vld [vmem:[#allocation7 + $0x38] ss:$24 sps:$4 sm:$0xff]   ;;  %247 = vmatprep.subr.bf16.mxu0 %v475_v14  ;;  %v484_v19 = vld [vmem:[#allocation7 + $0xc] ss:$24 sps:$4 sm:$0xff]  }
  0x2a   :  { %v481_v18 = vld [vmem:[#allocation7 + $0x4] ss:$24 sps:$4 sm:$0xff]   ;;  %290 = vmatprep.subr.bf16.mxu1 %v478_v16  ;;  %248 = vmatpush1.bf16.msra.mxu0 %v477_v15  ;;  %v483_v20 = vld [vmem:[#allocation7] ss:$24 sps:$4 sm:$0xff]   ;;  %v431_v31 = vld [vmem:[%s654_s1] ss:$0 sm:$0xff] }
  0x2b   :  { %291 = vmatpush1.bf16.msra.mxu1 %v480_v17  ;;  %v486_v21 = vld [vmem:[#allocation7 + $0x8] ss:$24 sps:$4 sm:$0xff]   ;;  %249 = vmatprep.subr.bf16.mxu0 %v481_v18  ;;  %v489_v22 = vld [vmem:[#allocation7 + $0x44] ss:$24 sps:$4 sm:$0xff]   ;;  %v492_v60 = vld [vmem:[#allocation7 + $0x14] ss:$24 sps:$4 sm:$0xff]  }
  0x2c   :  { %292 = vmatprep.subr.bf16.mxu1 %v484_v19  ;;  %v432_v33 = vld [vmem:[#allocation5] ss:$0 sm:$0xff]  ;;  %v487_v58 = vld [vmem:[#allocation7 + $0x40] ss:$24 sps:$4 sm:$0xff]   ;;  %v490_v61 = vld [vmem:[#allocation7 + $0x10] ss:$24 sps:$4 sm:$0xff]  }
  0x2d   :  { %68 = vadd.xlane.f32.xlu0 %v67_v3  ;;  %v143_v63 = vshrl.u32 %v142_v62, 7 }
  0x2e   :  { %250 = vmatpush1.bf16.msra.mxu0 %v483_v20 }
  0x2f   :  { %293 = vmatpush1.bf16.msra.mxu1 %v486_v21  ;;  %333 = vmatprep.subr.bf16.mxu0 %v489_v22  ;;  %v144_v2 = vsub.s32 0, %v143_v63  ;;  %v148_v3 = vsub.s32 1, %v143_v63  ;;  %v164_v17 = vsub.s32 5, %v143_v63 }
  0xb2   :  { %v66_v4 = vpop.xlane.xlu0 %65 }
  0xb3   :  { %v71_v5 = vmul.f32 0.03125, %v66_v4 }
  0xb5   :  { %v73_v6 = vsub.f32 %v61_v0, %v71_v5  ;;  %v152_v0 = vsub.s32 2, %v143_v63 }
  0xb6   :  { %v69_v7 = vpop.xlane.xlu0 %68 }
  0xb7   :  { %v72_v8 = vmul.f32 0.03125, %v69_v7  ;;  %v75_v9 = vmul.f32 %v73_v6, %v73_v6 }
  0xb9   :  { %v74_v10 = vsub.f32 %v62_v1, %v72_v8  ;;  %v77_v11 = vsel %vm63_vm0, %v75_v9, 0.0  ;;  %v140_v1 = vld [vmem:[%s657_s4] sm:$0x3f]  ;;  %s595_s4 = smov [#allocation8]  }
  0xba   :  { %78 = vadd.xlane.f32.xlu1 %v77_v11  ;;  %v153_v4 = vrot.slane %v140_v1, %v152_v0  ;;  %v145_v5 = vrot.slane %v140_v1, %v144_v2  ;;  %v160_v11 = vsub.s32 4, %v143_v63  ;;  %s418_s13 = sshll.u32 %s595_s4, 4  ;;  %s419_s13 = int_to_ptr.vmem [resolvable:$true] %s418_s13 }
  0xbb   :  { %v76_v12 = vmul.f32 %v74_v10, %v74_v10  ;;  %s561_s14 = scalar_lea.vmem %s419_s13, 768  ;;  %p566_p2 = scmp.lt.s32.totalorder %s419_s13, %s419_s13 }
  0xbc   :  { %p562_p1 = scmp.ne.s32.totalorder %s419_s13, %s561_s14  ;;  %p567_p3 = scmp.lt.s32.totalorder %s561_s14, %s561_s14 }
  0xbd   :  { %v80_v13 = vsel %vm63_vm0, %v76_v12, 0.0 }
  0xbe   :  { %81 = vadd.xlane.f32.xlu1 %v80_v13  ;;  %p568_p4 = por %p567_p3, %p566_p2 }
  0xc0   :  { %p569_p5 = pnand %p568_p4, %p562_p1 }
 0x143   :  { %v79_v24 = vpop.xlane.xlu1 %78 }
 0x144   :  { %v83_v25 = vmul.f32 0.03125, %v79_v24 }
 0x146   :  { %v85_v26 = vadd.f32 1e-05, %v83_v25 }
 0x147   :  { %v82_v27 = vpop.xlane.xlu1 %81 }
 0x148   :  { %493 = vrsqrt.f32 %v85_v26  ;;  %v84_v28 = vmul.f32 0.03125, %v82_v27 }
 0x14a   :  { %v86_v29 = vadd.f32 1e-05, %v84_v28  ;;  %v165_v28 = vrot.slane %v140_v1, %v164_v17 }
 0x14c   :  { %495 = vrsqrt.f32 %v86_v29 }
 0x155   :  { %v494_v30 = vpop.eup %493 }
 0x156   :  { %v89_v32 = vmul.f32 %v494_v30, %v73_v6  ;;  %v149_v6 = vrot.slane %v140_v1, %v148_v3 }
 0x158   :  { %v98_v34 = vmul.f32 %v431_v31, %v89_v32 }
 0x159   :  { %v496_v35 = vpop.eup %495 }
 0x15a   :  { %v107_v36 = vadd.f32 %v432_v33, %v98_v34  ;;  %v90_v37 = vmul.f32 %v496_v35, %v74_v10  ;;  %v156_v10 = vsub.s32 3, %v143_v63 }
 0x15c   :  { %v99_v38 = vmul.f32 %v431_v31, %v90_v37  ;;  %v111_v39 = vmul.f32 0.044715, %v107_v36  ;;  %v109_v53 = vmul.f32 0.5, %v107_v36  ;;  %v157_v21 = vrot.slane %v140_v1, %v156_v10 }
 0x15e   :  { %v108_v40 = vadd.f32 %v432_v33, %v99_v38  ;;  %v113_v41 = vmul.f32 %v111_v39, %v107_v36 }
 0x160   :  { %v112_v42 = vmul.f32 0.044715, %v108_v40  ;;  %v115_v43 = vmul.f32 %v113_v41, %v107_v36  ;;  %v110_v54 = vmul.f32 0.5, %v108_v40 }
 0x162   :  { %v114_v44 = vmul.f32 %v112_v42, %v108_v40  ;;  %v117_v45 = vadd.f32 %v115_v43, %v107_v36 }
 0x164   :  { %v116_v46 = vmul.f32 %v114_v44, %v108_v40  ;;  %v119_v47 = vmul.f32 0.7978846, %v117_v45 }
 0x166   :  { %v118_v48 = vadd.f32 %v116_v46, %v108_v40  ;;  %497 = vtanh.f32 %v119_v47 }
 0x168   :  { %v120_v49 = vmul.f32 0.7978846, %v118_v48 }
 0x16a   :  { %499 = vtanh.f32 %v120_v49 }
 0x173   :  { %v498_v50 = vpop.eup %497 }
 0x174   :  { %v123_v51 = vadd.f32 1.0, %v498_v50 }
 0x176   :  { %v125_v56 = vmul.f32 %v123_v51, %v109_v53 }
 0x177   :  { %v500_v52 = vpop.eup %499 }
 0x178   :  { %v124_v55 = vadd.f32 1.0, %v500_v52 }
 0x17a   :  { %v126_v57 = vmul.f32 %v124_v55, %v110_v54 }
 0x17c   :  { %v127_v59 = vpack.c.bf16 %v126_v57, %v125_v56 }
 0x17e   :  { %445 = vmatmul.mubr.msk.bf16.vlgmr.msra.gmra.mxu0 %vm63_vm0, %v127_v59  ;;  %446 = vmatmul.mubr.msk.bf16.vlgmr.msra.gmra.mxu1 %vm63_vm0, %v127_v59 }
 0x17f   :  { %334 = vmatpush1.bf16.msra.mxu0 %v487_v58  ;;  %353 = vmatprep.mubr.bf16.mxu0 %v594_v23  ;;  %v161_v23 = vrot.slane %v140_v1, %v160_v11 }
 0x180   :  { %335 = vmatprep.subr.bf16.mxu0 %v492_v60 }
 0x183   :  { %336 = vmatpush1.bf16.msra.mxu0 %v490_v61 }
 0x186   :  { %447 = vmatmul.mubr.msk.bf16.vlgmr.msra.gmra.mxu0 %vm63_vm0, %v127_v59 }
 0x23e   :  { %v269_v7 = vpop.f32.mrf.mxu0  ;;  %v312_v8 = vpop.f32.mrf.mxu1 }
 0x23f   :  { %v313_v9 = vadd.f32 %v312_v8, %v153_v4  ;;  %v270_v14 = vadd.f32 %v269_v7, %v145_v5 }
 0x240   :  { %v271_v12 = vpop.f32.mrf.mxu0  ;;  %v314_v13 = vpop.f32.mrf.mxu1 }
 0x241   :  { %v457_v15 = vpack.c.bf16 %v313_v9, %v313_v9  ;;  %v272_v16 = vadd.f32 %v271_v12, %v149_v6  ;;  %v315_v30 = vadd.f32 %v314_v13, %v157_v21 }
 0x242   :  { %v273_v18 = vpop.f32.mrf.mxu0  ;;  %v316_v19 = vpop.f32.mrf.mxu1 }
 0x243   :  { %385 = vst [vmem:[#allocation8 + $0x8] sm:$0xf] %v457_v15  ;;  %v456_v20 = vpack.c.bf16 %v272_v16, %v270_v14  ;;  %v317_v22 = vadd.f32 %v316_v19, %v153_v4  ;;  %v274_v25 = vadd.f32 %v273_v18, %v145_v5 }
 0x244   :  { %v275_v24 = vpop.f32.mrf.mxu0  ;;  %v318_v33 = vpop.f32.mrf.mxu1 }
 0x245   :  { %384 = vst [vmem:[#allocation8] sm:$0xff] %v456_v20  ;;  %v459_v26 = vpack.c.bf16 %v317_v22, %v317_v22  ;;  %v276_v27 = vadd.f32 %v275_v24, %v149_v6  ;;  %v319_v38 = vadd.f32 %v318_v33, %v157_v21 }
 0x246   :  { %v355_v29 = vpop.f32.mrf.mxu0 }
 0x247   :  { %387 = vst [vmem:[#allocation8 + $0x14] sm:$0xf] %v459_v26  ;;  %v458_v31 = vpack.c.bf16 %v276_v27, %v274_v25  ;;  %v356_v32 = vadd.f32 %v355_v29, %v161_v23 }
 0x248   :  { %v357_v34 = vpop.f32.mrf.mxu0 }
 0x249   :  { %386 = vst [vmem:[#allocation8 + $0xc] sm:$0xff] %v458_v31  ;;  %v460_v35 = vpack.c.bf16 %v356_v32, %v315_v30  ;;  %v358_v36 = vadd.f32 %v357_v34, %v165_v28 }
 0x24a   :  { %v359_v37 = vpop.f32.mrf.mxu0 }
 0x24b   :  { %409 = vst [vmem:[#allocation8 + $0x18] sm:$0xff] %v460_v35  ;;  %v461_v39 = vpack.c.bf16 %v358_v36, %v358_v36  ;;  %v360_v40 = vadd.f32 %v359_v37, %v161_v23 }
 0x24c   :  { %v361_v41 = vpop.f32.mrf.mxu0 }
 0x24d   :  { %410 = vst [vmem:[#allocation8 + $0x20] sm:$0xf] %v461_v39  ;;  %v462_v42 = vpack.c.bf16 %v360_v40, %v319_v38  ;;  %v362_v43 = vadd.f32 %v361_v41, %v165_v28 }
 0x24f   :  { %411 = vst [vmem:[#allocation8 + $0x24] sm:$0xff] %v462_v42  ;;  %v463_v44 = vpack.c.bf16 %v362_v43, %v362_v43 }
 0x251   :  { %412 = vst [vmem:[#allocation8 + $0x2c] sm:$0xf] %v463_v44 }
 0x252   :  { %572 = shalt.err (!%p569_p5)
}
 0x253   :  { %s596_s15 = smov 192   ;;  %s597_s16 = smov 12  }
 0x254   :  { %424 = dma.vmem_to_hbm [thread:$0]  %s419_s13, 768, %s658_s5, [#allocation4], %s596_s15, %s596_s15, %s597_s16  }
 0x255   :  { %585 = dma.done.wait [#allocation4], 768  }
 0x256   :  { %586 = vsyncadd [#allocation4], 4294966528 }
 0x257   :  { %428 = vsyncpa [#allocation3], 1 }
 0x258   :  { %429 = vsyncpa [#allocation6], 1 }
 0x259   :  { %430 = vsyncpa [#allocation4], 1 }

</bundles_post_ra>
